<compile_context>
chip_gen: v5e
topology: v5e:2x2
jax: 0.10.0
libtpu: 0.0.40
codegen_flags: <defaults>
</compile_context>

<pallas_src>
import math

import jax
import jax.numpy as jnp
from jax import lax
from jax.experimental import pallas as pl
from jax.experimental.pallas import tpu as pltpu


_MiB = 1024 * 1024
_VMEM_BUDGET = 20 * _MiB   # padded, double-buffered working-set cap (v7x-safe)
_VMEM_LIMIT = 32 * _MiB    # scoped VMEM requested from Mosaic
_STEP_TARGET = 4 * _MiB    # per-grid-step activation traffic target
_VPU_MAC_MAX = 64          # c_in*c_out at/below this -> unrolled VPU FMAs (NCHW)
_BIG_WEIGHT = 4 * _MiB     # above this, single-buffer the constant weight block


def _round_up(x: int, m: int) -> int:
    return ((x + m - 1) // m) * m


def _sublane(dtype) -> int:
    # Packed sublane tile: 8 rows f32, 16 bf16, 32 int8/fp8.
    return max(8, 32 // jnp.dtype(dtype).itemsize)


def _padded_bytes(shape, dtype) -> int:
    # VMEM buffers pad the lane dim to 128 and the second-minor dim to the
    # dtype's sublane tile; estimate the REAL footprint so the shrink loop
    # fires when C << 128 (matters on v7x's smaller VMEM).
    itemsize = jnp.dtype(dtype).itemsize
    dims = list(shape)
    if not dims:
        return itemsize
    dims[-1] = _round_up(dims[-1], 128)
    if len(dims) >= 2:
        dims[-2] = _round_up(dims[-2], _sublane(dtype))
    n = 1
    for d in dims:
        n *= d
    return n * itemsize


_TC_COUNT = None


def _num_tensorcores() -> int:
    """TensorCores per chip (2 on v7x, 1 on v5e/v6e).  Defensive fallback: 1."""
    global _TC_COUNT
    if _TC_COUNT is not None:
        return _TC_COUNT
    cores = 1
    try:
        info = pltpu.get_tpu_info()
        for attr in ("num_cores", "core_count", "num_tensorcores",
                     "cores_per_chip", "num_cores_per_chip"):
            v = getattr(info, attr, None)
            try:
                v = int(v)
            except (TypeError, ValueError):
                continue
            if v > 0:
                cores = v
                break
    except Exception:
        cores = 1
    _TC_COUNT = cores
    return cores


# ----------------------------------------------------------------------------
# channel_last=True kernels (row-tiled).
# ----------------------------------------------------------------------------
def _rows_packed_kernel(x_ref, w_ref, b_ref, o_ref):
    # x_ref: (tm, k*C_in), w_ref: (k*C_in, k*C_out) = kron(I_k, W^T), b: (1, k*C_out)
    acc = jnp.dot(x_ref[...], w_ref[...], preferred_element_type=jnp.float32)
    o_ref[...] = (acc + b_ref[...]).astype(o_ref.dtype)


def _rows_plain_kernel(x_ref, w_ref, b_ref, o_ref):
    # x_ref: (tm, C_in), w_ref: (C_out, C_in).  Contract dim 1 of BOTH operands:
    # no wrapper-side weight.T (the MXU handles the transposed contraction).
    acc = lax.dot_general(x_ref[...], w_ref[...],
                          dimension_numbers=(((1,), (1,)), ((), ())),
                          preferred_element_type=jnp.float32)
    o_ref[...] = (acc + b_ref[...]).astype(o_ref.dtype)


def _launch_rows(kernel, x2d, w_op, b_row, c_out_cols, w_single_buffer):
    n, c_in_cols = x2d.shape
    dtype = x2d.dtype
    sub = _sublane(dtype)
    itemsize = jnp.dtype(dtype).itemsize

    # Row tile sized for ~_STEP_TARGET bytes of (lane-padded) activation traffic
    # per grid step, so the ~0.35us fixed step overhead is amortised.
    row_bytes = (_round_up(c_in_cols, 128) + _round_up(c_out_cols, 128)) * itemsize
    tm = _round_up(max(sub, _STEP_TARGET // max(row_bytes, 1)), sub)
    tm = min(tm, _round_up(n, sub))

    # Only split a single full-extent step when a second TensorCore exists.
    n_tc = _num_tensorcores()
    if n_tc > 1 and pl.cdiv(n, tm) < n_tc and n > sub:
        tm = _round_up(pl.cdiv(n, n_tc), sub)

    w_bufs = 1 if w_single_buffer else 2

    def working_set(t):
        return (2 * (_padded_bytes((t, c_in_cols), dtype)
                     + _padded_bytes((t, c_out_cols), dtype))
                + w_bufs * _padded_bytes(w_op.shape, w_op.dtype)
                + 2 * _padded_bytes(b_row.shape, b_row.dtype))

    while tm > sub and working_set(tm) > _VMEM_BUDGET:
        tm = max(sub, _round_up(tm // 2, sub))

    if w_single_buffer:
        # Constant weight block: single-buffer so it doesn't eat the VMEM room
        # needed for large activation tiles (v7x: 64 MiB physical).
        # TODO(synk): add a K-tiled fallback ('arbitrary' axis + f32 accumulator
        # scratch) for weights that approach the VMEM budget on their own.
        w_spec = pl.BlockSpec(w_op.shape, lambda i: (0, 0),
                              pipeline_mode=pl.Buffered(1))
    else:
        w_spec = pl.BlockSpec(w_op.shape, lambda i: (0, 0))

    grid = (pl.cdiv(n, tm),)  # ragged last block: OOB rows are never written back
    return pl.pallas_call(
        kernel,
        out_shape=jax.ShapeDtypeStruct((n, c_out_cols), dtype),
        grid_spec=pltpu.PrefetchScalarGridSpec(
            num_scalar_prefetch=0,
            grid=grid,
            in_specs=[
                pl.BlockSpec((tm, c_in_cols), lambda i: (i, 0)),
                w_spec,
                pl.BlockSpec((1, c_out_cols), lambda i: (0, 0)),
            ],
            out_specs=pl.BlockSpec((tm, c_out_cols), lambda i: (i, 0)),
        ),
        compiler_params=pltpu.CompilerParams(
            dimension_semantics=("parallel",),
            vmem_limit_bytes=_VMEM_LIMIT,
        ),
    )(x2d, w_op, b_row)


def _pick_pack_factor(n: int, c_in: int, c_out: int) -> int:
    """Rows-per-lane-group k for the block-diagonal packing (1 = don't pack)."""
    if n <= 1 or c_out >= 128:
        return 1
    k_out = 128 // math.gcd(128, c_out)            # k*C_out multiple of 128
    k_in = 128 // math.gcd(128, c_in)              # k*C_in  multiple of 128
    k_both = k_out * k_in // math.gcd(k_out, k_in)
    for k in (k_both, k_out):                      # prefer both dims lane-dense
        if k <= 1 or n % k != 0:
            continue
        if k * c_in > 1024 or k * c_out > 1024:    # keep kron(I_k, W^T) small
            continue
        return k
    return 1


def _linear_channel_last(x, weight, bias):
    c_out, c_in = weight.shape
    lead = x.shape[:-1]
    n = 1
    for d in lead:
        n *= d
    x2d = x.reshape(n, c_in)

    k = _pick_pack_factor(n, c_in, c_out)
    if k > 1:
        # Block-diagonal kron(I_k, W^T): (k*C_in, k*C_out); bias tiled k times.
        eye = jnp.eye(k, dtype=weight.dtype)
        w_packed = (eye[:, None, :, None]
                    * jnp.transpose(weight)[None, :, None, :]
                    ).reshape(k * c_in, k * c_out)
        b_packed = jnp.tile(bias, (k,)).reshape(1, k * c_out)
        w_big = w_packed.size * jnp.dtype(w_packed.dtype).itemsize > _BIG_WEIGHT
        y = _launch_rows(_rows_packed_kernel,
                         x2d.reshape(n // k, k * c_in),   # free contiguous reshape
                         w_packed, b_packed, k * c_out,
                         w_single_buffer=w_big)
        return y.reshape(n, c_out).reshape(*lead, c_out)

    w_big = weight.size * jnp.dtype(weight.dtype).itemsize > _BIG_WEIGHT
    y = _launch_rows(_rows_plain_kernel, x2d, weight, bias.reshape(1, c_out),
                     c_out, w_single_buffer=w_big)
    return y.reshape(*lead, c_out)


# ----------------------------------------------------------------------------
# channel_last=False kernel: y[b, :, s] = W @ x[b, :, s] + bias, spatial in lanes.
# ----------------------------------------------------------------------------
def _make_nchw_kernel(c_in: int, c_out: int, use_vpu: bool):
    def kernel(x_ref, w_ref, b_ref, o_ref):
        # x_ref: (1, C_in, t_s), w_ref: (C_out, C_in), b_ref: (C_out, 1)
        x = x_ref[0]                                        # (C_in, t_s)
        if use_vpu:
            # Tiny c_in*c_out: unrolled FMA chain on dense (C_out, t_s) slabs.
            # Casts hoisted out of the trace-time-unrolled loop; MXU skipped.
            xf = x.astype(jnp.float32)
            w = w_ref[...].astype(jnp.float32)              # (C_out, C_in)
            acc = jnp.broadcast_to(b_ref[...].astype(jnp.float32),
                                   (c_out, xf.shape[-1]))
            for ci in range(c_in):
                acc = acc + w[:, ci:ci + 1] * xf[ci:ci + 1, :]
        else:
            acc = jnp.dot(w_ref[...], x,
                          preferred_element_type=jnp.float32) + b_ref[...]
        o_ref[0] = acc.astype(o_ref.dtype)
    return kernel


def _pallas_linear_nchw(x3, w, b_col):
    """x3 (B, C_in, S) -> (B, C_out, S) with y[b,:,s] = w @ x3[b,:,s] + b."""
    bsz, c_in, s = x3.shape
    c_out = w.shape[0]
    dtype = x3.dtype
    itemsize = jnp.dtype(dtype).itemsize
    sub = _sublane(dtype)

    # Spatial (lane) tile sized for ~_STEP_TARGET bytes per step; channels sit
    # on sublanes (padded to the dtype tile), spatial pads to 128 lanes unless
    # it is the full extent.
    col_bytes = (_round_up(c_in, sub) + _round_up(c_out, sub)) * itemsize
    t_s = _round_up(max(128, _STEP_TARGET // max(col_bytes, 1)), 128)
    if t_s >= s:
        t_s = s                                    # full extent: lane-dense, legal

    def working_set(t):
        return (2 * (_padded_bytes((c_in, t), dtype)
                     + _padded_bytes((c_out, t), dtype))
                + 2 * _padded_bytes(w.shape, w.dtype)
                + 2 * _padded_bytes(b_col.shape, b_col.dtype))

    while t_s > 128 and working_set(t_s) > _VMEM_BUDGET:
        t_s = max(128, _round_up(t_s // 2, 128))

    # Megacore: split only if a second TensorCore exists (v7x).
    n_tc = _num_tensorcores()
    if n_tc > 1 and bsz * pl.cdiv(s, t_s) < n_tc and s > 256:
        t_s = _round_up(pl.cdiv(s, n_tc), 128)

    use_vpu = (c_in * c_out) <= _VPU_MAC_MAX
    kernel = _make_nchw_kernel(c_in, c_out, use_vpu)

    grid = (bsz, pl.cdiv(s, t_s))
    return pl.pallas_call(
        kernel,
        out_shape=jax.ShapeDtypeStruct((bsz, c_out, s), dtype),
        grid_spec=pltpu.PrefetchScalarGridSpec(
            num_scalar_prefetch=0,
            grid=grid,
            in_specs=[
                pl.BlockSpec((1, c_in, t_s), lambda bi, sj: (bi, 0, sj)),
                pl.BlockSpec((c_out, c_in), lambda bi, sj: (0, 0)),
                pl.BlockSpec((c_out, 1), lambda bi, sj: (0, 0)),
            ],
            out_specs=pl.BlockSpec((1, c_out, t_s), lambda bi, sj: (bi, 0, sj)),
        ),
        compiler_params=pltpu.CompilerParams(
            dimension_semantics=("parallel", "parallel"),
            vmem_limit_bytes=_VMEM_LIMIT,
        ),
    )(x3, w, b_col)


# ----------------------------------------------------------------------------
# FeatureConverter forward.
# ----------------------------------------------------------------------------
def feature_converter_forward(x, weight, bias, *, channel_last: bool = True):
    """weight: (C_out, C_in) (PyTorch nn.Linear convention), bias: (C_out,).

    channel_last=True : linear applied to the LAST axis of x.
    channel_last=False: x (B, C_in, D1..Dk) -> y (B, C_out, D1..Dk).
    """
    c_out, c_in = weight.shape

    if channel_last:
        return _linear_channel_last(x, weight, bias)

    # channel_last == False: keep NCHW; collapsing trailing spatial dims is a
    # contiguous (free) reshape, unlike the PyTorch permute round trip.
    bsz = x.shape[0]
    spatial = x.shape[2:]
    s = 1
    for d in spatial:
        s *= d
    x3 = x.reshape(bsz, c_in, s)
    y3 = _pallas_linear_nchw(x3, weight, bias.reshape(c_out, 1))
    return y3.reshape(bsz, c_out, *spatial)


# ----------------------------------------------------------------------------
# Reference (plain JAX) for correctness check.
# ----------------------------------------------------------------------------
def _reference(x, weight, bias, channel_last):
    if channel_last:
        return x @ weight.T + bias
    ndim = x.ndim
    dims = list(range(ndim))
    permute_order = [0] + dims[2:] + [1]
    xp = jnp.transpose(x, permute_order)
    yp = xp @ weight.T + bias
    inv = [0] * ndim
    for i, p in enumerate(permute_order):
        inv[p] = i
    return jnp.transpose(yp, inv)


if __name__ == "__main__":
    key = jax.random.PRNGKey(0)
    k_w, k_b, k_x1, k_x2, k_x3, k_w2, k_b2, k_x4 = jax.random.split(key, 8)

    # Small-channel converter (c_in=4 -> c_out=8), PyTorch nn.Linear init bounds.
    c_in, c_out = 4, 8
    B, H, W = 2, 16, 16
    bound = 1.0 / float(c_in) ** 0.5
    weight = jax.random.uniform(k_w, (c_out, c_in), jnp.float32, -bound, bound)
    bias = jax.random.uniform(k_b, (c_out,), jnp.float32, -bound, bound)

    # 1) channel_last=False (native NCHW, VPU path): (B,C_in,H,W) -> (B,C_out,H,W)
    x_cf = jax.random.normal(k_x1, (B, c_in, H, W), jnp.float32)
    y_cf = jax.block_until_ready(
        feature_converter_forward(x_cf, weight, bias, channel_last=False))
    assert y_cf.shape == (B, c_out, H, W)
    assert jnp.allclose(y_cf, _reference(x_cf, weight, bias, False),
                        atol=1e-5, rtol=1e-5)

    # 2) channel_last=True (k-row lane-packed MXU path): (B,H,W,C_in) -> (...,C_out)
    x_cl = jax.random.normal(k_x2, (B, H, W, c_in), jnp.float32)
    y_cl = jax.block_until_ready(
        feature_converter_forward(x_cl, weight, bias, channel_last=True))
    assert y_cl.shape == (B, H, W, c_out)
    assert jnp.allclose(y_cl, _reference(x_cl, weight, bias, True),
                        atol=1e-5, rtol=1e-5)

    # 3) channel_last=True with N not divisible by the pack factor -> plain path.
    x_odd = jax.random.normal(k_x3, (2, 3, 5, c_in), jnp.float32)
    y_odd = jax.block_until_ready(
        feature_converter_forward(x_odd, weight, bias, channel_last=True))
    assert y_odd.shape == (2, 3, 5, c_out)
    assert jnp.allclose(y_odd, _reference(x_odd, weight, bias, True),
                        atol=1e-5, rtol=1e-5)

    # 4) Larger channel count, channel_last=False -> NCHW MXU path.
    c_in2, c_out2 = 16, 24
    bound2 = 1.0 / float(c_in2) ** 0.5
    weight2 = jax.random.uniform(k_w2, (c_out2, c_in2), jnp.float32, -bound2, bound2)
    bias2 = jax.random.uniform(k_b2, (c_out2,), jnp.float32, -bound2, bound2)
    x_big = jax.random.normal(k_x4, (2, c_in2, 8, 8), jnp.float32)
    y_big = jax.block_until_ready(
        feature_converter_forward(x_big, weight2, bias2, channel_last=False))
    assert y_big.shape == (2, c_out2, 8, 8)
    assert jnp.allclose(y_big, _reference(x_big, weight2, bias2, False),
                        atol=1e-5, rtol=1e-5)

    print("KERNEL_OK")
</pallas_src>

<mosaic_0001>
module attributes {stable_mosaic.version = 11 : i64} {
  func.func @kernel(%arg0: i32, %arg1: i32, %arg2: memref<1x4x256xf32, #tpu.memory_space<vmem>>, %arg3: memref<8x4xf32, #tpu.memory_space<vmem>>, %arg4: memref<8x1xf32, #tpu.memory_space<vmem>>, %arg5: memref<1x8x256xf32, #tpu.memory_space<vmem>>) attributes {dimension_semantics = [#tpu.dimension_semantics<parallel>, #tpu.dimension_semantics<parallel>], iteration_bounds = array<i64: 2, 1>, scalar_prefetch = 0 : i64, scratch_operands = 0 : i64, tpu.core_type = #tpu.core_type<tc>, window_params = [{transform_indices = @transform_0, window_bounds = array<i64: 1, 4, 256>}, {pipeline_mode = #tpu.pipeline_mode<synchronous>, transform_indices = @transform_1, window_bounds = array<i64: 8, 4>}, {pipeline_mode = #tpu.pipeline_mode<synchronous>, transform_indices = @transform_2, window_bounds = array<i64: 8, 1>}, {transform_indices = @transform_3, window_bounds = array<i64: 1, 8, 256>}]} {
    %c0 = arith.constant 0 : index
    %c0_0 = arith.constant 0 : index
    %c0_1 = arith.constant 0 : index
    %0 = vector.load %arg2[%c0, %c0_0, %c0_1] : memref<1x4x256xf32, #tpu.memory_space<vmem>>, vector<1x4x256xf32>
    %1 = vector.shape_cast %0 : vector<1x4x256xf32> to vector<4x256xf32>
    %c0_2 = arith.constant 0 : index
    %c0_3 = arith.constant 0 : index
    %2 = vector.load %arg3[%c0_2, %c0_3] : memref<8x4xf32, #tpu.memory_space<vmem>>, vector<8x4xf32>
    %c0_4 = arith.constant 0 : index
    %c0_5 = arith.constant 0 : index
    %3 = vector.load %arg4[%c0_4, %c0_5] : memref<8x1xf32, #tpu.memory_space<vmem>>, vector<8x1xf32>
    %4 = vector.shape_cast %3 : vector<8x1xf32> to vector<8x1xf32>
    %5 = vector.broadcast %4 : vector<8x1xf32> to vector<8x256xf32>
    %6 = vector.extract_strided_slice %2 {offsets = [0, 0], sizes = [8, 1], strides = [1, 1]} : vector<8x4xf32> to vector<8x1xf32>
    %7 = vector.extract_strided_slice %1 {offsets = [0, 0], sizes = [1, 256], strides = [1, 1]} : vector<4x256xf32> to vector<1x256xf32>
    %8 = vector.broadcast %6 : vector<8x1xf32> to vector<8x256xf32>
    %9 = vector.broadcast %7 : vector<1x256xf32> to vector<8x256xf32>
    %10 = arith.mulf %8, %9 : vector<8x256xf32>
    %11 = arith.addf %5, %10 : vector<8x256xf32>
    %12 = vector.extract_strided_slice %2 {offsets = [0, 1], sizes = [8, 1], strides = [1, 1]} : vector<8x4xf32> to vector<8x1xf32>
    %13 = vector.extract_strided_slice %1 {offsets = [1, 0], sizes = [1, 256], strides = [1, 1]} : vector<4x256xf32> to vector<1x256xf32>
    %14 = vector.broadcast %12 : vector<8x1xf32> to vector<8x256xf32>
    %15 = vector.broadcast %13 : vector<1x256xf32> to vector<8x256xf32>
    %16 = arith.mulf %14, %15 : vector<8x256xf32>
    %17 = arith.addf %11, %16 : vector<8x256xf32>
    %18 = vector.extract_strided_slice %2 {offsets = [0, 2], sizes = [8, 1], strides = [1, 1]} : vector<8x4xf32> to vector<8x1xf32>
    %19 = vector.extract_strided_slice %1 {offsets = [2, 0], sizes = [1, 256], strides = [1, 1]} : vector<4x256xf32> to vector<1x256xf32>
    %20 = vector.broadcast %18 : vector<8x1xf32> to vector<8x256xf32>
    %21 = vector.broadcast %19 : vector<1x256xf32> to vector<8x256xf32>
    %22 = arith.mulf %20, %21 : vector<8x256xf32>
    %23 = arith.addf %17, %22 : vector<8x256xf32>
    %24 = vector.extract_strided_slice %2 {offsets = [0, 3], sizes = [8, 1], strides = [1, 1]} : vector<8x4xf32> to vector<8x1xf32>
    %25 = vector.extract_strided_slice %1 {offsets = [3, 0], sizes = [1, 256], strides = [1, 1]} : vector<4x256xf32> to vector<1x256xf32>
    %26 = vector.broadcast %24 : vector<8x1xf32> to vector<8x256xf32>
    %27 = vector.broadcast %25 : vector<1x256xf32> to vector<8x256xf32>
    %28 = arith.mulf %26, %27 : vector<8x256xf32>
    %29 = arith.addf %23, %28 : vector<8x256xf32>
    %c0_6 = arith.constant 0 : index
    %c0_7 = arith.constant 0 : index
    %c0_8 = arith.constant 0 : index
    %30 = vector.load %arg5[%c0_6, %c0_7, %c0_8] : memref<1x8x256xf32, #tpu.memory_space<vmem>>, vector<1x8x256xf32>
    %31 = vector.shape_cast %30 : vector<1x8x256xf32> to vector<8x256xf32>
    %32 = vector.shape_cast %29 : vector<8x256xf32> to vector<1x8x256xf32>
    tpu.vector_store %arg5[%c0_6, %c0_7, %c0_8], %32 {strides = array<i32>} : memref<1x8x256xf32, #tpu.memory_space<vmem>>, vector<1x8x256xf32>,
    return
  }
  func.func @transform_0(%arg0: i32, %arg1: i32) -> (i32, i32, i32) {
    %c0_i32 = arith.constant 0 : i32
    %c0_i32_0 = arith.constant 0 : i32
    return %arg0, %c0_i32, %arg1 : i32, i32, i32
  }
  func.func @transform_1(%arg0: i32, %arg1: i32) -> (i32, i32) {
    %c0_i32 = arith.constant 0 : i32
    %c0_i32_0 = arith.constant 0 : i32
    %c0_i32_1 = arith.constant 0 : i32
    return %c0_i32, %c0_i32_0 : i32, i32
  }
  func.func @transform_2(%arg0: i32, %arg1: i32) -> (i32, i32) {
    %c0_i32 = arith.constant 0 : i32
    %c0_i32_0 = arith.constant 0 : i32
    %c0_i32_1 = arith.constant 0 : i32
    return %c0_i32, %c0_i32_0 : i32, i32
  }
  func.func @transform_3(%arg0: i32, %arg1: i32) -> (i32, i32, i32) {
    %c0_i32 = arith.constant 0 : i32
    %c0_i32_0 = arith.constant 0 : i32
    return %arg0, %c0_i32, %arg1 : i32, i32, i32
  }
}

</mosaic_0001>

<bundles_post_ra>
// kernel: tpu_custom_call.1
= control target key start
LH: loop header
LB: loop body
LE: loop exit
PB: predicated region body
PF: predicated region fallthrough
CT: control target
= control target key end

     0   :  { %8 = vsyncpa [#allocation3], 0  ;;  %s653_s0 = inlined_call_operand.vmem [shape: f32[2,4,256], index: 0, kind: input, shape index: {}]   ;;  %s654_s1 = inlined_call_operand.vmem [shape: f32[8,4], index: 1, kind: input, shape index: {}]   ;;  %s655_s2 = inlined_call_operand.vmem [shape: f32[8,1], index: 2, kind: input, shape index: {}]   ;;  %s656_s3 = inlined_call_operand.hbm [shape: f32[2,8,256], index: 3, kind: output, shape index: {}]  }
   0x1   :  { %10 = vsyncpa [#allocation3 + $0x1], 0  ;;  %s546_s12 = smov 0   ;;  %s548_s13 = smov 0  }
   0x2   :  { %s550_s14 = smov 0   ;;  %s552_s15 = smov 0  }
   0x3   :  { %s554_s16 = smov 0   ;;  %s556_s17 = smov 0  }
   0x4 LB: > { %s363_s18 = sadd.s32 4294967295, %s520_s17   ;;  %s364_s19 = sadd.s32 4294967294, %s520_s17   ;;  %s520_s17 = sphi %s556_s17, %s16_s17   ;;  %s516_s16 = sphi %s554_s16, %s663_s16   ;;  %s512_s15 = sphi %s552_s15, %s662_s15   ;;  %s508_s14 = sphi %s550_s14, %s661_s14   ;;  %s504_s13 = sphi %s548_s13, %s660_s13   ;;  %s500_s12 = sphi %s546_s12, %s659_s12  }
   0x5   : > { %s28_s20 = sadd.s32 1, %s516_s16  ;;  %s107_s21 = sadd.s32 1, %s508_s14 }
   0x6   : > { %p30_p0 = scmp.ge.s32.totalorder %s28_s20, 2  ;;  %p117_p1 = scmp.ne.s32.totalorder %s508_s14, %s504_s13 }
   0x7   : > { %p118_p2 = scmp.eq.s32.totalorder %s363_s18, 1  ;;  %p123_p3 = scmp.ne.s32.totalorder %s504_s13, %s500_s12 }
   0x8   : > { %s665_s20 = smov (%p30_p0, %s28_s20), 0  ;;  %p124_p5 = scmp.eq.s32.totalorder %s364_s19, 1 }
   0x9   : > { %p586_p4 = por %p118_p2, %p117_p1  ;;  %s102_s23 = ssub.s32 %s516_s16, %s665_s20 }
   0xa   : > { %p367_p6 = scmp.ge.s32.totalorder %s520_s17, 1  ;;  %p105_p7 = scmp.eq.s32.totalorder %s102_s23, 0 }
   0xb   : > { %p593_p8 = por %p124_p5, %p123_p3  ;;  %p161_p9 = scmp.lt.s32.totalorder %s520_s17, 3 }
   0xc   : > { %s599_s25 = scalar_select %p105_p7, %s508_s14, %s107_s21  }
   0xd   : > { %p162_p10 = pnand %p367_p6, %p161_p9 }
   0xe   : > { %p190_p11 = scmp.lt.s32.totalorder (!%p162_p10), %s512_s15, 1  ;;  %s186_s8 = sand.u32 (!%p162_p10), 1, %s504_s13  }
   0xf   : > { %165 = sbr.rel (%p162_p10) target bundleno = 157 (0x9d), region = 32  ;;  %s368_s9 = sshll.u32 (!%p162_p10), %s186_s8, 4 }
  0x10   : > { %s377_s10 = sshll.u32 (!%p162_p10), %s512_s15, 4  ;;  %s269_s26 = scalar_lea.sflag (!%p162_p10), [#allocation3], %s186_s8 }
  0x11   : > { %s282_s19 = scalar_lea.hbm (!%p162_p10), %s656_s3, %s377_s10 }
  0x12   : > { %s286_s23 = sshll.u32 (!%p162_p10), %s282_s19, 4  ;;  %s287_s23 = int_to_ptr.hbm [resolvable:$true] %s286_s23 }
  0x13   : > { %s456_s27 = sshra.s32 (!%p162_p10), %s287_s23, 4  ;;  %s457_s27 = int_to_ptr.hbm [resolvable:$true] %s456_s27 }
  0x14   : > { %v201_v0 = vld [vmem:[%s654_s1] sm:$0xff]  ;;  %v522_v1 = vmov 0   ;;  %v523_v2 = vmov 1   ;;  %v524_v3 = vmov 3   ;;  %v525_v5 = vmov 2   ;;  %s191_s30 = scalar_select %p190_p11, %s512_s15, 1 }
  0x15   : > { %437 = vset.pattern.permute.xlu0 %v522_v1  ;;  %438 = vset.pattern.permute.xlu1 %v523_v2  ;;  %v202_v4 = vld [vmem:[%s655_s2] sm:$0xff]  ;;  %s188_s15 = scalar_lea.vmem [#allocation2], %s368_s9  ;;  %s458_s28 = scalar_lea.hbm %s457_s27, 16 }
  0x16   : > { %210 = vperm.xlu0 %437, %v201_v0   ;;  %225 = vperm.xlu1 %438, %v201_v0   ;;  %s376_s4 = sshll.u32 %s191_s30, 3  ;;  %s284_s21 = sshll.u32 %s188_s15, 4  ;;  %s285_s21 = int_to_ptr.vmem [resolvable:$true] %s284_s21 }
  0x17   : > { %440 = vset.pattern.permute.xlu2 %v524_v3  ;;  %s197_s7 = scalar_lea.vmem %s653_s0, %s376_s4  ;;  %p459_p12 = scmp.ne.s32.totalorder %s457_s27, %s458_s28 }
  0x18   : > { %253 = vperm.xlu2 %440, %v201_v0   ;;  %v200_v6 = vld [vmem:[%s197_s7] sm:$0xff]  ;;  %s462_s4 = scalar_lea.hbm %s656_s3, 32  ;;  %p463_p1 = scmp.lt.s32.totalorder %s457_s27, %s656_s3 }
  0x19   : > { %v214_v7 = vperm.slane %v200_v6, 0  ;;  %v215_v8 = vperm.slane %v200_v6, 4  ;;  %v228_v11 = vperm.slane %v200_v6, 1  ;;  %v229_v12 = vperm.slane %v200_v6, 5  ;;  %p460_p13 = pnand %p459_p12, %p586_p4  ;;  %p464_p2 = scmp.lt.s32.totalorder %s462_s4, %s458_s28 }
  0x1a   : > { %v242_v13 = vperm.slane %v200_v6, 2  ;;  %v243_v14 = vperm.slane %v200_v6, 6  ;;  %v256_v17 = vperm.slane %v200_v6, 3  ;;  %v257_v18 = vperm.slane %v200_v6, 7 }
  0x1b   : > { %v218_v15 = vperm.slane %v214_v7, 0  ;;  %v219_v16 = vperm.slane %v215_v8, 0  ;;  %v232_v19 = vperm.slane %v228_v11, 1  ;;  %v233_v20 = vperm.slane %v229_v12, 1  ;;  %p461_p0 = pneg %p460_p13  ;;  %p465_p3 = por %p464_p2, %p463_p1 }
  0x1c   : > { %v246_v21 = vperm.slane %v242_v13, 2  ;;  %v247_v22 = vperm.slane %v243_v14, 2  ;;  %v260_v25 = vperm.slane %v256_v17, 3  ;;  %v261_v26 = vperm.slane %v257_v18, 3 }
  0x1d   : > { %p466_p5 = pnand %p465_p3, %p461_p0 }
  0x1e   : > { %205 = vperm.xlu0 %437, %v202_v4   ;;  %439 = vset.pattern.permute.xlu1 %v525_v5 }
  0x1f   : > { %239 = vperm.xlu1 %439, %v201_v0  }
  0x26   : > { %441 = vset.pattern.permute.xlu0 %v524_v3 }
  0x72   : > { %v254_v28 = vpop.permute.xlu2 %253 }
  0x73   : > { %v262_v38 = vmul.f32 %v260_v25, %v254_v28  ;;  %v263_v39 = vmul.f32 %v261_v26, %v254_v28 }
  0x88   : > { %v211_v9 = vpop.permute.xlu0 %210  ;;  %v226_v10 = vpop.permute.xlu1 %225 }
  0x89   : > { %v220_v23 = vmul.f32 %v218_v15, %v211_v9  ;;  %v221_v24 = vmul.f32 %v219_v16, %v211_v9  ;;  %v234_v29 = vmul.f32 %v232_v19, %v226_v10  ;;  %v235_v30 = vmul.f32 %v233_v20, %v226_v10 }
  0x90   : > { %v206_v27 = vpop.permute.xlu0 %205 }
  0x91   : > { %v222_v31 = vadd.f32 %v220_v23, %v206_v27  ;;  %v223_v32 = vadd.f32 %v221_v24, %v206_v27  ;;  %v240_v33 = vpop.permute.xlu1 %239 }
  0x92   : > { %v248_v34 = vmul.f32 %v246_v21, %v240_v33  ;;  %v249_v35 = vmul.f32 %v247_v22, %v240_v33 }
  0x93   : > { %v236_v36 = vadd.f32 %v234_v29, %v222_v31  ;;  %v237_v37 = vadd.f32 %v235_v30, %v223_v32 }
  0x95   : > { %v250_v40 = vadd.f32 %v248_v34, %v236_v36  ;;  %v251_v41 = vadd.f32 %v249_v35, %v237_v37 }
  0x97   : > { %v264_v42 = vadd.f32 %v262_v38, %v250_v40  ;;  %v265_v43 = vadd.f32 %v263_v39, %v251_v41 }
  0x99   : > { %266 = vst [vmem:[%s188_s15] sm:$0xff] %v264_v42 }
  0x9a   : > { %267 = vst [vmem:[%s188_s15 + $0x8] sm:$0xff] %v265_v43 }
  0x9b   : > { %469 = shalt.err (!%p466_p5)
}
  0x9c   : > { %378 = dma.vmem_to_hbm [thread:$0]  (%p586_p4), %s285_s21, 256, %s287_s23, %s269_s26  }
  0x9d PF: > { %p384_p6 = scmp.ge.s32.totalorder %s520_s17, 2  ;;  %s298_s7 = sand.u32 1, %s500_s12  }
  0x9e   : > { %s299_s8 = scalar_lea.sflag [#allocation3], %s298_s7 }
  0x9f   : > { %p381_p7 = pnand %p384_p6, %p593_p8 }
  0xa1   : > { %p382_p9 = pneg %p381_p7 }
  0xa3   : > { %495 = dma.done.wait (%p382_p9), %s299_s8, 256  }
  0xa4   : > { %497 = vsyncadd (%p382_p9), %s299_s8, 4294967040  ;;  %s16_s17 = sadd.s32 1, %s520_s17   ;;  %s659_s12 = smov %s504_s13 }
  0xa5   : > { %p13_p10 = scmp.ge.s32.totalorder %s16_s17, 4   ;;  %s660_s13 = smov %s508_s14 }
  0xa6   : > { %s661_s14 = smov %s599_s25  ;;  %s662_s15 = smov %s516_s16 }
  0xa7   : > { %s663_s16 = smov %s665_s20  ;;  %15 = sbr.rel (!%p13_p10) target bundleno = 4 (0x4), region = 67 }
  0xac   :  { %305 = vsyncpa [#allocation3], 1 }
  0xad   :  { %307 = vsyncpa [#allocation3 + $0x1], 1 }

</bundles_post_ra>
